<compile_context>
chip_gen: v7x
topology: tpu7x:2x2x1
jax: 0.10.0
libtpu: 0.0.40
codegen_flags: <defaults>
</compile_context>

<pallas_src>
import functools

import jax
import jax.numpy as jnp
from jax.experimental import pallas as pl
from jax.experimental.pallas import tpu as pltpu

BN_EPS = 1e-5
TILE_B = 512   # target batch-tile rows for large batches
LANE = 128
SUBLANE_F32 = 8
SUBLANE_BF16 = 16


def _round_up(n, m):
    return ((n + m - 1) // m) * m


def _cdiv(a, b):
    return -(-a // b)


# ----------------------------------------------------------------------------- kernel
def _mlp_kernel(x_ref, w1_ref, b1_ref, w2_ref, b2_ref, w3_ref, b3_ref, out_ref):
    # Weights/x are already in their compute dtype (f32 or bf16) -> no per-step casts.
    # Accumulation and all elementwise math (bias, ReLU, sigmoid) stay f32.
    x = x_ref[...]

    # hidden layer 1: (BN-folded) Linear + ReLU    [Dropout is identity in eval]
    h = jnp.dot(x, w1_ref[...], preferred_element_type=jnp.float32)
    h = jnp.maximum(h + b1_ref[...], 0.0)
    # TODO(synk): training-mode dropout (random masking) not implemented; eval mode only.

    # hidden layer 2: (BN-folded) Linear + ReLU
    h = jnp.dot(h.astype(w2_ref.dtype), w2_ref[...], preferred_element_type=jnp.float32)
    h = jnp.maximum(h + b2_ref[...], 0.0)

    # output layer (lane-padded): Linear + sigmoid
    logits = jnp.dot(h.astype(w3_ref.dtype), w3_ref[...],
                     preferred_element_type=jnp.float32) + b3_ref[...]
    out_ref[...] = jax.nn.sigmoid(logits).astype(out_ref.dtype)


# ----------------------------------------------------------------------------- wrapper
@functools.partial(jax.jit, static_argnames=("output_dim", "use_bf16"))
def improved_multilabel_classifier(x, folded_params, output_dim, use_bf16=False):
    """Fused MLP forward: sigmoid(W3 @ relu(W2' @ relu(W1' @ x)))  (BN folded into W')."""
    B, F = x.shape
    w1, b1 = folded_params["w1"], folded_params["b1"]
    w2, b2 = folded_params["w2"], folded_params["b2"]
    w3, b3 = folded_params["w3"], folded_params["b3"]
    H1p, H2p, O_pad = w1.shape[1], w2.shape[1], w3.shape[1]

    # bf16 MXU-operand path: x cast once here; weights were cast once in fold_bn_into_linear.
    if use_bf16:
        x = x.astype(jnp.bfloat16)
    out_dtype = jnp.bfloat16 if use_bf16 else jnp.float32

    # Batch tiling: pad B up to a sublane-aligned tile; keep >=2 grid steps for moderate B
    # so megacore (v7x) can shard the batch axis; cap tiles at TILE_B rows for large B.
    sub = SUBLANE_BF16 if use_bf16 else SUBLANE_F32
    if B > 2 * TILE_B:
        tile_b = TILE_B
    else:
        tile_b = max(_round_up(_cdiv(B, 2), sub), sub)
    B_pad = _round_up(B, tile_b)
    if B_pad != B:
        x = jnp.pad(x, ((0, B_pad - B), (0, 0)))
    grid = (B_pad // tile_b,)

    const2d = lambda shape: pl.BlockSpec(shape, lambda i: (0, 0))  # VMEM-resident params

    # VMEM budget: resident weights/biases + double-buffered x/out tiles + f32 intermediates.
    x_item = 2 if use_bf16 else 4
    out_item = 2 if use_bf16 else 4
    w_bytes = sum(int(a.size) * a.dtype.itemsize for a in (w1, b1, w2, b2, w3, b3))
    io_bytes = 2 * tile_b * F * x_item + 2 * tile_b * O_pad * out_item
    scratch_bytes = tile_b * (H1p + H2p + O_pad) * 4
    vmem_limit = int(1.5 * (w_bytes + io_bytes + scratch_bytes)) + (4 << 20)
    vmem_limit = min(max(vmem_limit, 32 << 20), 100 << 20)

    cost = pl.CostEstimate(
        flops=2 * B_pad * (F * H1p + H1p * H2p + H2p * O_pad),
        transcendentals=2 * B_pad * O_pad,  # sigmoid ~ exp + reciprocal per element
        bytes_accessed=(B_pad * F * x_item + w_bytes + B_pad * O_pad * out_item),
    )

    out = pl.pallas_call(
        _mlp_kernel,
        out_shape=jax.ShapeDtypeStruct((B_pad, O_pad), out_dtype),
        grid=grid,
        in_specs=[
            pl.BlockSpec((tile_b, F), lambda i: (i, 0)),   # x: tiled over batch
            const2d(w1.shape), const2d(b1.shape),
            const2d(w2.shape), const2d(b2.shape),
            const2d(w3.shape), const2d(b3.shape),
        ],
        out_specs=pl.BlockSpec((tile_b, O_pad), lambda i: (i, 0)),
        compiler_params=pltpu.CompilerParams(
            dimension_semantics=("parallel",),             # megacore sharding on v7x
            vmem_limit_bytes=vmem_limit,
        ),
        cost_estimate=cost,
    )(x, w1, b1, w2, b2, w3, b3)

    return out[:B, :output_dim]


# ----------------------------------------------------------------------------- params
def init_params(key, input_dim, hidden_dims, output_dim):
    """Raw parameters matching PyTorch layer shapes (Linear stored as [in, out])."""
    dims = [input_dim] + list(hidden_dims) + [output_dim]
    keys = jax.random.split(key, 2 * len(dims))
    params = {}

    def linear_init(kw, kb, fan_in, fan_out):
        bound = 1.0 / jnp.sqrt(fan_in)
        w = jax.random.uniform(kw, (fan_in, fan_out), jnp.float32, -bound, bound)
        b = jax.random.uniform(kb, (1, fan_out), jnp.float32, -bound, bound)
        return w, b

    params["w1"], params["b1"] = linear_init(keys[0], keys[1], dims[0], dims[1])
    params["g1"] = jnp.ones((1, dims[1]), jnp.float32)
    params["be1"] = jnp.zeros((1, dims[1]), jnp.float32)
    params["m1"] = jnp.zeros((1, dims[1]), jnp.float32)
    params["v1"] = jnp.ones((1, dims[1]), jnp.float32)

    params["w2"], params["b2"] = linear_init(keys[2], keys[3], dims[1], dims[2])
    params["g2"] = jnp.ones((1, dims[2]), jnp.float32)
    params["be2"] = jnp.zeros((1, dims[2]), jnp.float32)
    params["m2"] = jnp.zeros((1, dims[2]), jnp.float32)
    params["v2"] = jnp.ones((1, dims[2]), jnp.float32)

    params["w3"], params["b3"] = linear_init(keys[4], keys[5], dims[2], dims[3])
    return params


def fold_bn_into_linear(params, use_bf16=False):
    """One-time transform: fold eval-mode BatchNorm into the preceding Linear, zero-pad
    hidden and output widths to 128-lane multiples, and (optionally) cast weights to bf16.
    Biases stay f32 (elementwise math is f32 in-kernel)."""
    def fold(w, b, g, be, m, v):
        s = g * jax.lax.rsqrt(v + BN_EPS)        # (1, N)
        return w * s, (b - m) * s + be           # y = (xW + b') after folding == BN(xW + b)

    w1, b1 = fold(params["w1"], params["b1"], params["g1"], params["be1"],
                  params["m1"], params["v1"])
    w2, b2 = fold(params["w2"], params["b2"], params["g2"], params["be2"],
                  params["m2"], params["v2"])
    w3, b3 = params["w3"], params["b3"]

    H1, H2, O = w1.shape[1], w2.shape[1], w3.shape[1]
    H1p, H2p, Op = _round_up(H1, LANE), _round_up(H2, LANE), _round_up(O, LANE)

    # Pad hidden/output widths. Correctness: pad bias = 0 -> ReLU(0) = 0, and padded rows
    # of the following weight are 0, so padded lanes never contribute.
    w1 = jnp.pad(w1, ((0, 0), (0, H1p - H1)))
    b1 = jnp.pad(b1, ((0, 0), (0, H1p - H1)))
    w2 = jnp.pad(w2, ((0, H1p - H1), (0, H2p - H2)))
    b2 = jnp.pad(b2, ((0, 0), (0, H2p - H2)))
    w3 = jnp.pad(w3, ((0, H2p - H2), (0, Op - O)))
    b3 = jnp.pad(b3, ((0, 0), (0, Op - O)))

    if use_bf16:
        w1, w2, w3 = (a.astype(jnp.bfloat16) for a in (w1, w2, w3))

    return {"w1": w1, "b1": b1, "w2": w2, "b2": b2, "w3": w3, "b3": b3}


def reference_forward(x, params):
    """Pure-JAX reference (un-folded BN, eval-mode semantics)."""
    h = x @ params["w1"] + params["b1"]
    h = (h - params["m1"]) * jax.lax.rsqrt(params["v1"] + BN_EPS) * params["g1"] + params["be1"]
    h = jnp.maximum(h, 0.0)
    h = h @ params["w2"] + params["b2"]
    h = (h - params["m2"]) * jax.lax.rsqrt(params["v2"] + BN_EPS) * params["g2"] + params["be2"]
    h = jnp.maximum(h, 0.0)
    return jax.nn.sigmoid(h @ params["w3"] + params["b3"])


if __name__ == "__main__":
    key = jax.random.PRNGKey(0)
    k_x, k_p = jax.random.split(key)

    batch = 8
    input_dim = 32
    hidden_dims = (64, 32)
    output_dim = 16

    x = jax.random.normal(k_x, (batch, input_dim), jnp.float32)
    params = init_params(k_p, input_dim, hidden_dims, output_dim)
    ref = reference_forward(x, params)

    # f32 path
    folded_f32 = fold_bn_into_linear(params, use_bf16=False)
    out = improved_multilabel_classifier(x, folded_f32, output_dim, use_bf16=False)
    out = jax.block_until_ready(out)
    assert out.shape == (batch, output_dim)
    assert jnp.allclose(out, ref, atol=1e-5, rtol=1e-5), "f32 mismatch vs reference"

    # bf16 MXU-operand path (weights + x cast once outside the kernel): looser tolerance.
    folded_bf16 = fold_bn_into_linear(params, use_bf16=True)
    out_bf16 = improved_multilabel_classifier(x, folded_bf16, output_dim, use_bf16=True)
    out_bf16 = jax.block_until_ready(out_bf16)
    assert out_bf16.shape == (batch, output_dim)
    assert jnp.allclose(out_bf16.astype(jnp.float32), ref, atol=2e-2, rtol=2e-2), \
        "bf16 mismatch vs reference"

    print("KERNEL_OK")
</pallas_src>

<mosaic_0001>
module attributes {stable_mosaic.version = 11 : i64} {
  func.func @_mlp_kernel(%arg0: i32, %arg1: memref<8x32xf32, #tpu.memory_space<vmem>>, %arg2: memref<32x128xf32, #tpu.memory_space<vmem>>, %arg3: memref<1x128xf32, #tpu.memory_space<vmem>>, %arg4: memref<128x128xf32, #tpu.memory_space<vmem>>, %arg5: memref<1x128xf32, #tpu.memory_space<vmem>>, %arg6: memref<128x128xf32, #tpu.memory_space<vmem>>, %arg7: memref<1x128xf32, #tpu.memory_space<vmem>>, %arg8: memref<8x128xf32, #tpu.memory_space<vmem>>) attributes {dimension_semantics = [#tpu.dimension_semantics<parallel>], iteration_bounds = array<i64: 1>, scalar_prefetch = 0 : i64, scratch_operands = 0 : i64, tpu.core_type = #tpu.core_type<tc>, window_params = [{transform_indices = @transform_0, window_bounds = array<i64: 8, 32>}, {pipeline_mode = #tpu.pipeline_mode<synchronous>, transform_indices = @transform_1, window_bounds = array<i64: 32, 128>}, {pipeline_mode = #tpu.pipeline_mode<synchronous>, transform_indices = @transform_2, window_bounds = array<i64: 1, 128>}, {pipeline_mode = #tpu.pipeline_mode<synchronous>, transform_indices = @transform_3, window_bounds = array<i64: 128, 128>}, {pipeline_mode = #tpu.pipeline_mode<synchronous>, transform_indices = @transform_4, window_bounds = array<i64: 1, 128>}, {pipeline_mode = #tpu.pipeline_mode<synchronous>, transform_indices = @transform_5, window_bounds = array<i64: 128, 128>}, {pipeline_mode = #tpu.pipeline_mode<synchronous>, transform_indices = @transform_6, window_bounds = array<i64: 1, 128>}, {transform_indices = @transform_7, window_bounds = array<i64: 8, 128>}]} {
    %c0 = arith.constant 0 : index
    %c0_0 = arith.constant 0 : index
    %0 = vector.load %arg1[%c0, %c0_0] : memref<8x32xf32, #tpu.memory_space<vmem>>, vector<8x32xf32>
    %c0_1 = arith.constant 0 : index
    %c0_2 = arith.constant 0 : index
    %1 = vector.load %arg2[%c0_1, %c0_2] : memref<32x128xf32, #tpu.memory_space<vmem>>, vector<32x128xf32>
    %cst = arith.constant dense<0.000000e+00> : vector<8x128xf32>
    %2 = tpu.matmul %0, %1, %cst {dimension_numbers = #tpu.dot_dimension_numbers<[1], [0], [0], [1], [0, 0, 1, 1], [], []>} : vector<8x32xf32>, vector<32x128xf32>, vector<8x128xf32> -> vector<8x128xf32>
    %c0_3 = arith.constant 0 : index
    %c0_4 = arith.constant 0 : index
    %3 = vector.load %arg3[%c0_3, %c0_4] : memref<1x128xf32, #tpu.memory_space<vmem>>, vector<1x128xf32>
    %4 = vector.broadcast %3 : vector<1x128xf32> to vector<8x128xf32>
    %5 = arith.addf %2, %4 : vector<8x128xf32>
    %cst_5 = arith.constant 0.000000e+00 : f32
    %6 = vector.broadcast %cst_5 : f32 to vector<8x128xf32>
    %7 = arith.maximumf %5, %6 : vector<8x128xf32>
    %c0_6 = arith.constant 0 : index
    %c0_7 = arith.constant 0 : index
    %8 = vector.load %arg4[%c0_6, %c0_7] : memref<128x128xf32, #tpu.memory_space<vmem>>, vector<128x128xf32>
    %cst_8 = arith.constant dense<0.000000e+00> : vector<8x128xf32>
    %9 = tpu.matmul %7, %8, %cst_8 {dimension_numbers = #tpu.dot_dimension_numbers<[1], [0], [0], [1], [0, 0, 1, 1], [], []>} : vector<8x128xf32>, vector<128x128xf32>, vector<8x128xf32> -> vector<8x128xf32>
    %c0_9 = arith.constant 0 : index
    %c0_10 = arith.constant 0 : index
    %10 = vector.load %arg5[%c0_9, %c0_10] : memref<1x128xf32, #tpu.memory_space<vmem>>, vector<1x128xf32>
    %11 = vector.broadcast %10 : vector<1x128xf32> to vector<8x128xf32>
    %12 = arith.addf %9, %11 : vector<8x128xf32>
    %cst_11 = arith.constant 0.000000e+00 : f32
    %13 = vector.broadcast %cst_11 : f32 to vector<8x128xf32>
    %14 = arith.maximumf %12, %13 : vector<8x128xf32>
    %c0_12 = arith.constant 0 : index
    %c0_13 = arith.constant 0 : index
    %15 = vector.load %arg6[%c0_12, %c0_13] : memref<128x128xf32, #tpu.memory_space<vmem>>, vector<128x128xf32>
    %cst_14 = arith.constant dense<0.000000e+00> : vector<8x128xf32>
    %16 = tpu.matmul %14, %15, %cst_14 {dimension_numbers = #tpu.dot_dimension_numbers<[1], [0], [0], [1], [0, 0, 1, 1], [], []>} : vector<8x128xf32>, vector<128x128xf32>, vector<8x128xf32> -> vector<8x128xf32>
    %c0_15 = arith.constant 0 : index
    %c0_16 = arith.constant 0 : index
    %17 = vector.load %arg7[%c0_15, %c0_16] : memref<1x128xf32, #tpu.memory_space<vmem>>, vector<1x128xf32>
    %18 = vector.broadcast %17 : vector<1x128xf32> to vector<8x128xf32>
    %19 = arith.addf %16, %18 : vector<8x128xf32>
    %20 = arith.negf %19 : vector<8x128xf32>
    %21 = math.exp %20 : vector<8x128xf32>
    %cst_17 = arith.constant 1.000000e+00 : f32
    %22 = vector.broadcast %cst_17 : f32 to vector<8x128xf32>
    %23 = arith.addf %22, %21 : vector<8x128xf32>
    %24 = arith.divf %22, %23 : vector<8x128xf32>
    %c0_18 = arith.constant 0 : index
    %c0_19 = arith.constant 0 : index
    %25 = vector.load %arg8[%c0_18, %c0_19] : memref<8x128xf32, #tpu.memory_space<vmem>>, vector<8x128xf32>
    tpu.vector_store %arg8[%c0_18, %c0_19], %24 {strides = array<i32>} : memref<8x128xf32, #tpu.memory_space<vmem>>, vector<8x128xf32>,
    return
  }
  func.func @transform_0(%arg0: i32) -> (i32, i32) {
    %c0_i32 = arith.constant 0 : i32
    %c0_i32_0 = arith.constant 0 : i32
    return %arg0, %c0_i32 : i32, i32
  }
  func.func @transform_1(%arg0: i32) -> (i32, i32) {
    %c0_i32 = arith.constant 0 : i32
    %c0_i32_0 = arith.constant 0 : i32
    %c0_i32_1 = arith.constant 0 : i32
    return %c0_i32, %c0_i32_0 : i32, i32
  }
  func.func @transform_2(%arg0: i32) -> (i32, i32) {
    %c0_i32 = arith.constant 0 : i32
    %c0_i32_0 = arith.constant 0 : i32
    %c0_i32_1 = arith.constant 0 : i32
    return %c0_i32, %c0_i32_0 : i32, i32
  }
  func.func @transform_3(%arg0: i32) -> (i32, i32) {
    %c0_i32 = arith.constant 0 : i32
    %c0_i32_0 = arith.constant 0 : i32
    %c0_i32_1 = arith.constant 0 : i32
    return %c0_i32, %c0_i32_0 : i32, i32
  }
  func.func @transform_4(%arg0: i32) -> (i32, i32) {
    %c0_i32 = arith.constant 0 : i32
    %c0_i32_0 = arith.constant 0 : i32
    %c0_i32_1 = arith.constant 0 : i32
    return %c0_i32, %c0_i32_0 : i32, i32
  }
  func.func @transform_5(%arg0: i32) -> (i32, i32) {
    %c0_i32 = arith.constant 0 : i32
    %c0_i32_0 = arith.constant 0 : i32
    %c0_i32_1 = arith.constant 0 : i32
    return %c0_i32, %c0_i32_0 : i32, i32
  }
  func.func @transform_6(%arg0: i32) -> (i32, i32) {
    %c0_i32 = arith.constant 0 : i32
    %c0_i32_0 = arith.constant 0 : i32
    %c0_i32_1 = arith.constant 0 : i32
    return %c0_i32, %c0_i32_0 : i32, i32
  }
  func.func @transform_7(%arg0: i32) -> (i32, i32) {
    %c0_i32 = arith.constant 0 : i32
    %c0_i32_0 = arith.constant 0 : i32
    return %arg0, %c0_i32 : i32, i32
  }
}

</mosaic_0001>

<bundles_post_ra>
// kernel: improved_multilabel_classifier.1
= control target key start
LH: loop header
LB: loop body
LE: loop exit
PB: predicated region body
PF: predicated region fallthrough
CT: control target
= control target key end

     0   :  { %12 = vsyncpa [#allocation3], 0  ;;  %s838_s0 = inlined_call_operand.hbm [shape: f32[8,32], index: 0, kind: input, shape index: {}]   ;;  %s839_s1 = inlined_call_operand.hbm [shape: f32[32,128], index: 1, kind: input, shape index: {}]   ;;  %s840_s2 = inlined_call_operand.vmem [shape: f32[1,128], index: 2, kind: input, shape index: {}]   ;;  %s841_s3 = inlined_call_operand.hbm [shape: f32[128,128], index: 3, kind: input, shape index: {}]   ;;  %s842_s4 = inlined_call_operand.vmem [shape: f32[1,128], index: 4, kind: input, shape index: {}]   ;;  %s843_s5 = inlined_call_operand.hbm [shape: f32[128,128], index: 5, kind: input, shape index: {}]   ;;  %s844_s6 = inlined_call_operand.vmem [shape: f32[1,128], index: 6, kind: input, shape index: {}]   ;;  %s845_s7 = inlined_call_operand.hbm [shape: f32[8,128], index: 7, kind: output, shape index: {}]  }
   0x1   :  { %13 = vsyncpa [#allocation6], 0 }
   0x2   :  { %14 = vsyncpa [#allocation9], 0 }
   0x3   :  { %15 = vsyncpa [#allocation4], 0  ;;  %s689_s24 = smov [#allocation5]   ;;  %s571_s28 = scalar_lea.hbm %s839_s1, 512 }
   0x4   :  { %s31_s25 = sshll.u32 %s689_s24, 4  ;;  %p572_p0 = scmp.ne.s32.totalorder %s839_s1, %s571_s28  ;;  %s32_s25 = int_to_ptr.vmem [resolvable:$true] %s31_s25 }
   0x5   :  { %p575_p1 = scmp.lt.u32.totalorder %s571_s28, %s839_s1 }
   0x7   :  { %p577_p2 = pnand %p575_p1, %p572_p0 }
   0x9   :  { %580 = shalt.err (!%p577_p2)
}
   0xa   :  { %s581_s10 = scalar_lea.vmem %s32_s25, 512  ;;  %p586_p4 = scmp.lt.s32.totalorder %s32_s25, %s32_s25 }
   0xb   :  { %p582_p3 = scmp.ne.s32.totalorder %s32_s25, %s581_s10  ;;  %p587_p5 = scmp.lt.s32.totalorder %s581_s10, %s581_s10 }
   0xd   :  { %p588_p6 = por %p587_p5, %p586_p4 }
   0xf   :  { %p589_p7 = pnand %p588_p6, %p582_p3 }
  0x11   :  { %592 = shalt.err (!%p589_p7)
}
  0x12   :  { %s690_s11 = smov 128   ;;  %s691_s12 = smov 8  }
  0x13   :  { %37 = dma.hbm_to_vmem [thread:$0]  %s839_s1, 512, %s32_s25, [#allocation6], %s690_s11, %s690_s11, %s691_s12  }
  0x14   :  { %s692_s15 = smov [#allocation2]   ;;  %s693_s17 = smov [#allocation7]  }
  0x15   :  { %s22_s16 = sshll.u32 %s692_s15, 4  ;;  %s45_s18 = sshll.u32 %s693_s17, 4  ;;  %s23_s16 = int_to_ptr.vmem [resolvable:$true] %s22_s16  ;;  %s46_s18 = int_to_ptr.vmem [resolvable:$true] %s45_s18 }
  0x16   :  { %s593_s21 = scalar_lea.hbm %s838_s0, 128 }
  0x17   :  { %p594_p8 = scmp.ne.s32.totalorder %s838_s0, %s593_s21  ;;  %p597_p9 = scmp.lt.u32.totalorder %s593_s21, %s838_s0 }
  0x19   :  { %p599_p10 = pnand %p597_p9, %p594_p8 }
  0x1b   :  { %602 = shalt.err (!%p599_p10)
}
  0x1c   :  { %s603_s1 = scalar_lea.vmem %s23_s16, 128  ;;  %p608_p12 = scmp.lt.s32.totalorder %s23_s16, %s23_s16 }
  0x1d   :  { %p604_p11 = scmp.ne.s32.totalorder %s23_s16, %s603_s1  ;;  %p609_p13 = scmp.lt.s32.totalorder %s603_s1, %s603_s1 }
  0x1f   :  { %p610_p0 = por %p609_p13, %p608_p12 }
  0x21   :  { %p611_p1 = pnand %p610_p0, %p604_p11 }
  0x23   :  { %614 = shalt.err (!%p611_p1)
}
  0x24   :  { %25 = dma.hbm_to_vmem [thread:$0]  %s838_s0, 128, %s23_s16, [#allocation3]  }
  0x25   :  { %s615_s30 = scalar_lea.hbm %s841_s3, 2048 }
  0x26   :  { %p616_p2 = scmp.ne.s32.totalorder %s841_s3, %s615_s30  ;;  %p619_p3 = scmp.lt.u32.totalorder %s615_s30, %s841_s3 }
  0x28   :  { %p621_p4 = pnand %p619_p3, %p616_p2 }
  0x2a   :  { %624 = shalt.err (!%p621_p4)
}
  0x2b   :  { %s625_s14 = scalar_lea.vmem %s46_s18, 2048  ;;  %p630_p6 = scmp.lt.s32.totalorder %s46_s18, %s46_s18 }
  0x2c   :  { %p626_p5 = scmp.ne.s32.totalorder %s46_s18, %s625_s14  ;;  %p631_p7 = scmp.lt.s32.totalorder %s625_s14, %s625_s14 }
  0x2e   :  { %p632_p8 = por %p631_p7, %p630_p6 }
  0x30   :  { %p633_p9 = pnand %p632_p8, %p626_p5 }
  0x32   :  { %636 = shalt.err (!%p633_p9)
}
  0x33   :  { %51 = dma.hbm_to_vmem [thread:$0]  %s841_s3, 2048, %s46_s18, [#allocation6], %s690_s11, %s690_s11, %s691_s12  }
  0x34   :  { %s694_s16 = smov [#allocation8]   ;;  %s637_s21 = scalar_lea.hbm %s843_s5, 2048 }
  0x35   :  { %s59_s17 = sshll.u32 %s694_s16, 4  ;;  %p638_p10 = scmp.ne.s32.totalorder %s843_s5, %s637_s21  ;;  %s60_s17 = int_to_ptr.vmem [resolvable:$true] %s59_s17 }
  0x36   :  { %p641_p11 = scmp.lt.u32.totalorder %s637_s21, %s843_s5 }
  0x38   :  { %p643_p12 = pnand %p641_p11, %p638_p10 }
  0x3a   :  { %646 = shalt.err (!%p643_p12)
}
  0x3b   :  { %s647_s1 = scalar_lea.vmem %s60_s17, 2048  ;;  %p652_p0 = scmp.lt.s32.totalorder %s60_s17, %s60_s17 }
  0x3c   :  { %p648_p13 = scmp.ne.s32.totalorder %s60_s17, %s647_s1  ;;  %p653_p1 = scmp.lt.s32.totalorder %s647_s1, %s647_s1 }
  0x3e   :  { %p654_p2 = por %p653_p1, %p652_p0 }
  0x40   :  { %p655_p3 = pnand %p654_p2, %p648_p13 }
  0x42   :  { %658 = shalt.err (!%p655_p3)
}
  0x43   :  { %65 = dma.hbm_to_vmem [thread:$0]  %s843_s5, 2048, %s60_s17, [#allocation9], %s690_s11, %s690_s11, %s691_s12  }
  0x44   :  { %681 = dma.done.wait [#allocation3], 128  }
  0x45   :  { %682 = vsyncadd [#allocation3], 4294967168 }
  0x46   :  { %683 = dma.done.wait [#allocation6], 2560  }
  0x47   :  { %684 = vsyncadd [#allocation6], 4294964736 }
  0x48   :  { %685 = dma.done.wait [#allocation9], 2048  }
  0x49   :  { %686 = vsyncadd [#allocation9], 4294965248  ;;  %v695_v0 = vmov 0.0|0.0   ;;  %vm696_vm0 = vmmov 0   ;;  %v697_v1 = vmov 0.0   ;;  %v81_v2 = vld [vmem:[#allocation5] sm:$0xff] }
  0x4a   :  { %503 = vmatprep.subr.bf16.mxu0 %v695_v0  ;;  %430 = vmatprep.mubr.msk.f32.mxu0 %vm696_vm0, %v697_v1  ;;  %v82_v3 = vld [vmem:[#allocation5 + $0x8] sm:$0xff]  ;;  %v83_v4 = vld [vmem:[#allocation5 + $0x10] sm:$0xff]  ;;  %v84_v6 = vld [vmem:[#allocation5 + $0x18] sm:$0xff]  ;;  %vm92_vm1 = vcmask 261120   ;;  %s698_s28 = smov [#allocation10]  }
  0x4b   :  { %509 = vmatprep.subr.bf16.mxu1 %v695_v0  ;;  %465 = vmatprep.mubr.msk.f32.mxu1 %vm696_vm0, %v697_v1  ;;  %v504_v5 = vpack.c.bf16 %v82_v3, %v81_v2  ;;  %v167_v7 = vld [vmem:[#allocation7] sm:$0xff]  ;;  %v168_v8 = vld [vmem:[#allocation7 + $0x8] sm:$0xff]  ;;  %v169_v9 = vld [vmem:[#allocation7 + $0x10] sm:$0xff]  ;;  %v507_v11 = vpack.c.bf16 %v84_v6, %v83_v4  ;;  %s367_s29 = sshll.u32 %s698_s28, 4  ;;  %s368_s29 = int_to_ptr.vmem [resolvable:$true] %s367_s29 }
  0x4c   :  { %v170_v10 = vld [vmem:[#allocation7 + $0x18] sm:$0xff]  ;;  %v510_v12 = vpack.c.bf16 %v168_v8, %v167_v7  ;;  %v171_v14 = vld [vmem:[#allocation7 + $0x20] sm:$0xff]  ;;  %v172_v15 = vld [vmem:[#allocation7 + $0x28] sm:$0xff]  ;;  %p664_p5 = scmp.lt.s32.totalorder %s368_s29, %s368_s29 }
  0x4d   :  { %505 = vmatpush3.bf16.msra.mxu0 %v504_v5  ;;  %v513_v13 = vpack.c.bf16 %v170_v10, %v169_v9  ;;  %v80_v16 = vld [vmem:[#allocation2] sm:$0xff]  ;;  %v516_v17 = vpack.c.bf16 %v172_v15, %v171_v14  ;;  %v173_v18 = vld [vmem:[#allocation7 + $0x30] sm:$0xff]  ;;  %v175_v21 = vld [vmem:[#allocation7 + $0x40] sm:$0xff] }
  0x4e   :  { %506 = vmatprep.subr.bf16.mxu0 %v695_v0  ;;  %511 = vmatpush3.bf16.msra.mxu1 %v510_v12  ;;  %v174_v19 = vld [vmem:[#allocation7 + $0x38] sm:$0xff]  ;;  %v176_v22 = vld [vmem:[#allocation7 + $0x48] sm:$0xff]  ;;  %v177_v24 = vld [vmem:[#allocation7 + $0x50] sm:$0xff] }
  0x4f   :  { %512 = vmatprep.subr.bf16.mxu1 %v695_v0  ;;  %v519_v20 = vpack.c.bf16 %v174_v19, %v173_v18  ;;  %v522_v23 = vpack.c.bf16 %v176_v22, %v175_v21  ;;  %v178_v25 = vld [vmem:[#allocation7 + $0x58] sm:$0xff]  ;;  %v179_v27 = vld [vmem:[#allocation7 + $0x60] sm:$0xff]  ;;  %v180_v28 = vld [vmem:[#allocation7 + $0x68] sm:$0xff] }
  0x50   :  { %v525_v26 = vpack.c.bf16 %v178_v25, %v177_v24  ;;  %v528_v29 = vpack.c.bf16 %v180_v28, %v179_v27  ;;  %v181_v30 = vld [vmem:[#allocation7 + $0x70] sm:$0xff]  ;;  %v182_v31 = vld [vmem:[#allocation7 + $0x78] sm:$0xff]  ;;  %v261_v33 = vld [vmem:[#allocation8] sm:$0xff] }
  0x51   :  { %508 = vmatpush3.bf16.msra.mxu0 %v507_v11  ;;  %v531_v32 = vpack.c.bf16 %v182_v31, %v181_v30  ;;  %v262_v34 = vld [vmem:[#allocation8 + $0x8] sm:$0xff]  ;;  %v263_v35 = vld [vmem:[#allocation8 + $0x10] sm:$0xff]  ;;  %v264_v37 = vld [vmem:[#allocation8 + $0x18] sm:$0xff] }
  0x52   :  { %533 = vmatprep.subr.bf16.mxu0 %v695_v0  ;;  %514 = vmatpush3.bf16.msra.mxu1 %v513_v13  ;;  %v534_v36 = vpack.c.bf16 %v262_v34, %v261_v33  ;;  %v537_v38 = vpack.c.bf16 %v264_v37, %v263_v35  ;;  %v265_v39 = vld [vmem:[#allocation8 + $0x20] sm:$0xff]  ;;  %v266_v40 = vld [vmem:[#allocation8 + $0x28] sm:$0xff]  ;;  %v267_v42 = vld [vmem:[#allocation8 + $0x30] sm:$0xff] }
  0x53   :  { %515 = vmatprep.subr.bf16.mxu1 %v695_v0  ;;  %v540_v41 = vpack.c.bf16 %v266_v40, %v265_v39  ;;  %v268_v43 = vld [vmem:[#allocation8 + $0x38] sm:$0xff]  ;;  %v269_v45 = vld [vmem:[#allocation8 + $0x40] sm:$0xff]  ;;  %v270_v46 = vld [vmem:[#allocation8 + $0x48] sm:$0xff] }
  0x54   :  { %431 = vmatmul.mubr.msk.f32.vlgmr.msra.gmra.mrb[0].mxu0 %vm92_vm1, %v80_v16  ;;  %v543_v44 = vpack.c.bf16 %v268_v43, %v267_v42  ;;  %v546_v47 = vpack.c.bf16 %v270_v46, %v269_v45  ;;  %v271_v48 = vld [vmem:[#allocation8 + $0x50] sm:$0xff]  ;;  %v272_v49 = vld [vmem:[#allocation8 + $0x58] sm:$0xff]  ;;  %v273_v51 = vld [vmem:[#allocation8 + $0x60] sm:$0xff] }
  0x55   :  { %500 = vmatprep.mubr.msk.f32.mxu0 %vm696_vm0, %v697_v1  ;;  %535 = vmatpush3.bf16.msra.mxu0 %v534_v36  ;;  %v549_v50 = vpack.c.bf16 %v272_v49, %v271_v48  ;;  %v274_v52 = vld [vmem:[#allocation8 + $0x68] sm:$0xff]  ;;  %v378_v54 = vld [vmem:[%s840_s2] ss:$0 sm:$0xff]  ;;  %v275_v59 = vld [vmem:[#allocation8 + $0x70] sm:$0xff] }
  0x56   :  { %517 = vmatpush3.bf16.msra.mxu1 %v516_v17  ;;  %536 = vmatprep.subr.bf16.mxu0 %v695_v0  ;;  %v552_v53 = vpack.c.bf16 %v274_v52, %v273_v51  ;;  %v276_v60 = vld [vmem:[#allocation8 + $0x78] sm:$0xff] }
  0x57   :  { %518 = vmatprep.subr.bf16.mxu1 %v695_v0  ;;  %v555_v61 = vpack.c.bf16 %v276_v60, %v275_v59  ;;  %v380_v62 = vld [vmem:[%s842_s4] ss:$0 sm:$0xff]  ;;  %s659_s4 = scalar_lea.vmem %s368_s29, 128 }
  0x58   :  { %v381_v3 = vld [vmem:[%s844_s6] ss:$0 sm:$0xff]  ;;  %p660_p4 = scmp.ne.s32.totalorder %s368_s29, %s659_s4  ;;  %p665_p6 = scmp.lt.s32.totalorder %s659_s4, %s659_s4 }
  0x59   :  { %538 = vmatpush3.bf16.msra.mxu0 %v537_v38 }
  0x5a   :  { %520 = vmatpush3.bf16.msra.mxu1 %v519_v20  ;;  %539 = vmatprep.subr.bf16.mxu0 %v695_v0  ;;  %p666_p7 = por %p665_p6, %p664_p5 }
  0x5b   :  { %521 = vmatprep.subr.bf16.mxu1 %v695_v0 }
  0x5c   :  { %p667_p8 = pnand %p666_p7, %p660_p4 }
  0x5d   :  { %541 = vmatpush3.bf16.msra.mxu0 %v540_v41 }
  0x5e   :  { %523 = vmatpush3.bf16.msra.mxu1 %v522_v23  ;;  %542 = vmatprep.subr.bf16.mxu0 %v695_v0 }
  0x5f   :  { %524 = vmatprep.subr.bf16.mxu1 %v695_v0 }
  0x61   :  { %544 = vmatpush3.bf16.msra.mxu0 %v543_v44 }
  0x62   :  { %526 = vmatpush3.bf16.msra.mxu1 %v525_v26  ;;  %545 = vmatprep.subr.bf16.mxu0 %v695_v0 }
  0x63   :  { %527 = vmatprep.subr.bf16.mxu1 %v695_v0 }
  0x65   :  { %547 = vmatpush3.bf16.msra.mxu0 %v546_v47 }
  0x66   :  { %529 = vmatpush3.bf16.msra.mxu1 %v528_v29  ;;  %548 = vmatprep.subr.bf16.mxu0 %v695_v0 }
  0x67   :  { %530 = vmatprep.subr.bf16.mxu1 %v695_v0 }
  0x69   :  { %550 = vmatpush3.bf16.msra.mxu0 %v549_v50 }
  0x6a   :  { %532 = vmatpush3.bf16.msra.mxu1 %v531_v32  ;;  %551 = vmatprep.subr.bf16.mxu0 %v695_v0 }
  0x6d   :  { %553 = vmatpush3.bf16.msra.mxu0 %v552_v53 }
  0x6e   :  { %554 = vmatprep.subr.bf16.mxu0 %v695_v0 }
  0x71   :  { %556 = vmatpush3.bf16.msra.mxu0 %v555_v61 }
 0x127   :  { %v162_v55 = vpop.f32.mrb[0].mxu0 }
 0x128   :  { %v163_v56 = vadd.f32 %v378_v54, %v162_v55  ;;  %v432_v57 = vpop.f32.mrb[1].mxu0 }
 0x12a   :  { %v166_v58 = vmax.f32 %v163_v56, 0.0 }
 0x12c   :  { %466 = vmatmul.mubr.f32.vlgmr.msra.gmra.mrb[0].mxu1 %v166_v58 }
 0x1ff   :  { %v256_v63 = vpop.f32.mrb[0].mxu1 }
 0x200   :  { %v257_v1 = vadd.f32 %v380_v62, %v256_v63  ;;  %v467_v0 = vpop.f32.mrb[1].mxu1 }
 0x202   :  { %v260_v2 = vmax.f32 %v257_v1, 0.0 }
 0x204   :  { %501 = vmatmul.mubr.f32.vlgmr.msra.gmra.mrb[2].mxu0 %v260_v2 }
 0x2d7   :  { %v350_v4 = vpop.f32.mrb[2].mxu0 }
 0x2d8   :  { %v351_v5 = vadd.f32 %v381_v3, %v350_v4  ;;  %v502_v6 = vpop.f32.mrb[3].mxu0 }
 0x2da   :  { %v382_v7 = vmul.f32 -1.442695, %v351_v5 }
 0x2dc   :  { %567 = vpow2.f32 %v382_v7 }
 0x2e6   :  { %v568_v8 = vpop.eup %567 }
 0x2e7   :  { %v357_v9 = vadd.f32 1.0, %v568_v8 }
 0x2e9   :  { %569 = vrcp.f32 %v357_v9 }
 0x2f3   :  { %v570_v10 = vpop.eup %569 }
 0x2f4   :  { %360 = vst [vmem:[#allocation10] sm:$0xff] %v570_v10 }
 0x2f5   :  { %670 = shalt.err (!%p667_p8)
}
 0x2f6   :  { %s671_s8 = scalar_lea.hbm %s845_s7, 128 }
 0x2f7   :  { %p672_p9 = scmp.ne.s32.totalorder %s845_s7, %s671_s8  ;;  %p675_p10 = scmp.lt.u32.totalorder %s671_s8, %s845_s7 }
 0x2f9   :  { %p677_p11 = pnand %p675_p10, %p672_p9 }
 0x2fb   :  { %680 = shalt.err (!%p677_p11)
}
 0x2fc   :  { %370 = dma.vmem_to_hbm [thread:$0]  %s368_s29, 128, %s845_s7, [#allocation4]  }
 0x2fd   :  { %687 = dma.done.wait [#allocation4], 128  }
 0x2fe   :  { %688 = vsyncadd [#allocation4], 4294967168 }
 0x2ff   :  { %374 = vsyncpa [#allocation3], 1 }
 0x300   :  { %375 = vsyncpa [#allocation6], 1 }
 0x301   :  { %376 = vsyncpa [#allocation9], 1 }
 0x302   :  { %377 = vsyncpa [#allocation4], 1 }

</bundles_post_ra>
